<compile_context>
chip_gen: v5e
topology: v5e:2x2
jax: 0.10.0
libtpu: 0.0.40
codegen_flags: <defaults>
</compile_context>

<pallas_src>
import functools

import jax
import jax.numpy as jnp
from jax.experimental import pallas as pl
from jax.experimental.pallas import tpu as pltpu


def se_kernel(x_ref, p_ref, o_ref, *, nc, nmid, inv_hw):
    # x_ref: (N*C, HW)  native dtype, dense rows (sublanes fully used).
    # p_ref: (N*C + 1, 2*N*mid + 1) f32 packed parameter slab:
    #   [:N*C,  :N*mid]               kron(I_N, w1.T)
    #   [:N*C,  N*mid:2*N*mid]        kron(I_N, w2)
    #   [:N*C,  2*N*mid:2*N*mid+1]    tile(b2, N) as a column
    #   [N*C,   :N*mid]               tile(b1, N) as a row
    # o_ref: (N*C, 1) f32 sigmoid gate.

    # Global average pool: in-kernel upcast (f32 accumulation, bf16-safe on
    # v5e too) + lane reduce; 1/(H*W) folded into a compile-time constant.
    x = x_ref[...].astype(jnp.float32)                        # (N*C, HW)
    pooled = jnp.sum(x, axis=-1, keepdims=True) * inv_hw      # (N*C, 1)

    # Static sub-window loads from the single packed parameter tile.
    m1t = p_ref[0:nc, 0:nmid]                                 # (N*C, N*mid)
    m2 = p_ref[0:nc, nmid:2 * nmid]                           # (N*C, N*mid)
    b2c = p_ref[0:nc, 2 * nmid:2 * nmid + 1]                  # (N*C, 1)
    b1r = p_ref[nc:nc + 1, 0:nmid]                            # (1, N*mid)

    # FC1 + ReLU: block-diagonal broadcast product, reduced over the sublane
    # (batch*channel) axis.  h[0, n*mid + m] = sum_c w1[m,c] * pooled[n,c].
    h = jnp.sum(m1t * pooled, axis=0, keepdims=True) + b1r    # (1, N*mid)
    h = jnp.maximum(h, 0.0)

    # FC2 + sigmoid: broadcast product reduced over the lane axis.
    # s[n*C + c, 0] = sum_m w2[c,m] * h[n,m] + b2[c].
    s = jnp.sum(m2 * h, axis=-1, keepdims=True) + b2c         # (N*C, 1)
    o_ref[...] = jax.nn.sigmoid(s)


@jax.jit
def squeeze_excitation(x, w1, b1, w2, b2):
    """x: (N, C, H, W); w1: (mid, C); b1: (mid,); w2: (C, mid); b2: (C,).

    Returns the SE gate with shape (N, C, 1, 1), matching the PyTorch
    module's forward output (f32).
    """
    N, C, H, W = x.shape
    mid = w1.shape[0]
    HW = H * W
    NC, Nmid = N * C, N * mid

    # Native dtype, contiguous reshape only (no f32 copy through HBM).
    x_flat = x.reshape(NC, HW)

    # Pack every parameter into one tiny f32 slab -> a single input DMA and a
    # single padded VMEM tile.  Block-diagonal (kron) expansion keeps the
    # in-kernel FC stage reshape/transpose-free in the dense (N*C)-rows layout.
    eye = jnp.eye(N, dtype=jnp.float32)
    m1t = jnp.kron(eye, w1.T.astype(jnp.float32))             # (N*C, N*mid)
    m2 = jnp.kron(eye, w2.astype(jnp.float32))                # (N*C, N*mid)
    b1r = jnp.tile(b1.astype(jnp.float32), N)                 # (N*mid,)
    b2c = jnp.tile(b2.astype(jnp.float32), N)                 # (N*C,)

    params = jnp.zeros((NC + 1, 2 * Nmid + 1), jnp.float32)
    params = params.at[:NC, :Nmid].set(m1t)
    params = params.at[:NC, Nmid:2 * Nmid].set(m2)
    params = params.at[:NC, 2 * Nmid].set(b2c)
    params = params.at[NC, :Nmid].set(b1r)

    vmem = pl.BlockSpec(memory_space=pltpu.MemorySpace.VMEM)

    out = pl.pallas_call(
        functools.partial(se_kernel, nc=NC, nmid=Nmid, inv_hw=float(1.0 / HW)),
        out_shape=jax.ShapeDtypeStruct((NC, 1), jnp.float32),
        in_specs=[vmem, vmem],
        out_specs=vmem,
        # Explicit scoped-VMEM limit: safe on v5e/v6e/v7x; the resident data
        # here is only ~10 KiB.  Re-derive (and tile) before the slab nears
        # ~24-28 MiB on v7x / ~16 MiB default on v5e.
        compiler_params=pltpu.CompilerParams(vmem_limit_bytes=32 * 1024 * 1024),
    )(x_flat, params)

    return out.reshape(N, C, 1, 1)


def se_reference(x, w1, b1, w2, b2):
    pooled = jnp.mean(x.astype(jnp.float32), axis=(2, 3))     # (N, C)
    h = jnp.maximum(pooled @ w1.T + b1, 0.0)                  # (N, mid)
    s = jax.nn.sigmoid(h @ w2.T + b2)                         # (N, C)
    return s.reshape(x.shape[0], x.shape[1], 1, 1)


if __name__ == "__main__":
    # Module config: input_size=16, in_channels=4, out_channels=4, reduction_ratio=2
    N, C, H, W = 2, 4, 16, 16
    reduction_ratio = 2
    out_channels = 4
    mid = out_channels // reduction_ratio                     # fc_1 output channels

    key = jax.random.PRNGKey(0)
    kx, k1, k2, k3, k4 = jax.random.split(key, 5)
    x = jax.random.normal(kx, (N, C, H, W), dtype=jnp.float32)
    w1 = 0.1 * jax.random.normal(k1, (mid, C), dtype=jnp.float32)   # fc_1 (1x1 conv) weight
    b1 = 0.1 * jax.random.normal(k2, (mid,), dtype=jnp.float32)
    w2 = 0.1 * jax.random.normal(k3, (C, mid), dtype=jnp.float32)   # fc_2 (1x1 conv) weight
    b2 = 0.1 * jax.random.normal(k4, (C,), dtype=jnp.float32)

    out = squeeze_excitation(x, w1, b1, w2, b2)
    jax.block_until_ready(out)

    ref = se_reference(x, w1, b1, w2, b2)
    assert out.shape == (N, C, 1, 1)
    assert jnp.allclose(out, ref, atol=1e-5, rtol=1e-5)

    print("KERNEL_OK")
</pallas_src>

<mosaic_0001>
module attributes {stable_mosaic.version = 11 : i64} {
  func.func @se_kernel(%arg0: memref<8x256xf32, #tpu.memory_space<vmem>>, %arg1: memref<9x9xf32, #tpu.memory_space<vmem>>, %arg2: memref<8x1xf32, #tpu.memory_space<vmem>>) attributes {dimension_semantics = [], scalar_prefetch = 0 : i64, scratch_operands = 0 : i64, tpu.core_type = #tpu.core_type<tc>} {
    %c0 = arith.constant 0 : index
    %c0_0 = arith.constant 0 : index
    %0 = vector.load %arg0[%c0, %c0_0] : memref<8x256xf32, #tpu.memory_space<vmem>>, vector<8x256xf32>
    %cst = arith.constant dense<0.000000e+00> : vector<8xf32>
    %1 = vector.multi_reduction <add>, %0, %cst [1] : vector<8x256xf32> to vector<8xf32>
    %2 = vector.shape_cast %1 : vector<8xf32> to vector<8x1xf32>
    %cst_1 = arith.constant 3.906250e-03 : f32
    %3 = vector.broadcast %cst_1 : f32 to vector<8x1xf32>
    %4 = arith.mulf %2, %3 : vector<8x1xf32>
    %c0_2 = arith.constant 0 : index
    %c0_3 = arith.constant 0 : index
    %5 = vector.load %arg1[%c0_2, %c0_3] : memref<9x9xf32, #tpu.memory_space<vmem>>, vector<8x4xf32>
    %c0_4 = arith.constant 0 : index
    %c4 = arith.constant 4 : index
    %6 = vector.load %arg1[%c0_4, %c4] : memref<9x9xf32, #tpu.memory_space<vmem>>, vector<8x4xf32>
    %c0_5 = arith.constant 0 : index
    %c8 = arith.constant 8 : index
    %7 = vector.load %arg1[%c0_5, %c8] : memref<9x9xf32, #tpu.memory_space<vmem>>, vector<8x1xf32>
    %c8_6 = arith.constant 8 : index
    %c0_7 = arith.constant 0 : index
    %8 = vector.load %arg1[%c8_6, %c0_7] : memref<9x9xf32, #tpu.memory_space<vmem>>, vector<1x4xf32>
    %9 = vector.broadcast %4 : vector<8x1xf32> to vector<8x4xf32>
    %10 = arith.mulf %5, %9 : vector<8x4xf32>
    %cst_8 = arith.constant dense<0.000000e+00> : vector<4xf32>
    %11 = vector.multi_reduction <add>, %10, %cst_8 [0] : vector<8x4xf32> to vector<4xf32>
    %12 = vector.shape_cast %11 : vector<4xf32> to vector<1x4xf32>
    %13 = arith.addf %12, %8 : vector<1x4xf32>
    %cst_9 = arith.constant 0.000000e+00 : f32
    %14 = vector.broadcast %cst_9 : f32 to vector<1x4xf32>
    %15 = arith.maximumf %13, %14 : vector<1x4xf32>
    %16 = vector.broadcast %15 : vector<1x4xf32> to vector<8x4xf32>
    %17 = arith.mulf %6, %16 : vector<8x4xf32>
    %cst_10 = arith.constant dense<0.000000e+00> : vector<8xf32>
    %18 = vector.multi_reduction <add>, %17, %cst_10 [1] : vector<8x4xf32> to vector<8xf32>
    %19 = vector.shape_cast %18 : vector<8xf32> to vector<8x1xf32>
    %20 = arith.addf %19, %7 : vector<8x1xf32>
    %21 = arith.negf %20 : vector<8x1xf32>
    %22 = math.exp %21 : vector<8x1xf32>
    %cst_11 = arith.constant 1.000000e+00 : f32
    %23 = vector.broadcast %cst_11 : f32 to vector<8x1xf32>
    %24 = arith.addf %23, %22 : vector<8x1xf32>
    %25 = arith.divf %23, %24 : vector<8x1xf32>
    %c0_12 = arith.constant 0 : index
    %c0_13 = arith.constant 0 : index
    %26 = vector.load %arg2[%c0_12, %c0_13] : memref<8x1xf32, #tpu.memory_space<vmem>>, vector<8x1xf32>
    tpu.vector_store %arg2[%c0_12, %c0_13], %25 {strides = array<i32>} : memref<8x1xf32, #tpu.memory_space<vmem>>, vector<8x1xf32>,
    return
  }
}

</mosaic_0001>

<bundles_post_ra>
// kernel: tile.18
= control target key start
LH: loop header
LB: loop body
LE: loop exit
PB: predicated region body
PF: predicated region fallthrough
CT: control target
= control target key end

     0   :  { %s22_s0 = inlined_call_operand.vmem [shape: f32[4], index: 0, kind: input, shape index: {}]   ;;  %s23_s1 = inlined_call_operand.vmem [shape: f32[2,4], index: 1, kind: output, shape index: {}]  }
   0x1   :  { %v4_v0 = vld [vmem:[%s22_s0] ss:$0 sm:$0xff] }
   0x2   :  { %5 = vst [vmem:[%s23_s1] sm:$0x3] %v4_v0 }

// kernel: tile.13
= control target key start
LH: loop header
LB: loop body
LE: loop exit
PB: predicated region body
PF: predicated region fallthrough
CT: control target
= control target key end

     0   :  { %s22_s0 = inlined_call_operand.vmem [shape: f32[2], index: 0, kind: input, shape index: {}]   ;;  %s23_s1 = inlined_call_operand.vmem [shape: f32[2,2], index: 1, kind: output, shape index: {}]  }
   0x1   :  { %v4_v0 = vld [vmem:[%s22_s0] ss:$0 sm:$0xff] }
   0x2   :  { %5 = vst [vmem:[%s23_s1] sm:$0x3] %v4_v0 }

// kernel: squeeze_excitation.1
= control target key start
LH: loop header
LB: loop body
LE: loop exit
PB: predicated region body
PF: predicated region fallthrough
CT: control target
= control target key end

     0   :  { %vm20_vm0 = vcmask 31744   ;;  %s82_s17 = smov 124   ;;  %vm67_vm5 = vcmask 7168   ;;  %s116_s0 = inlined_call_operand.vmem [shape: f32[8,256], index: 0, kind: input, shape index: {}]   ;;  %s117_s1 = inlined_call_operand.vmem [shape: f32[9,9], index: 1, kind: input, shape index: {}]   ;;  %s118_s2 = inlined_call_operand.vmem [shape: f32[8,1], index: 2, kind: output, shape index: {}]  }
   0x1   :  { %v11_v0 = vld [vmem:[%s116_s0] sm:$0xff]  ;;  %v12_v1 = vld [vmem:[%s116_s0 + $0x8] sm:$0xff]  ;;  %s81_s0 = smov 4  }
   0x2   :  { %v13_v2 = vadd.f32 %v12_v1, %v11_v0  ;;  %v17_v3 = vld [vmem:[%s117_s1] sm:$0xff]  ;;  %v18_v13 = vld [vmem:[%s117_s1 + $0x8] sm:$0x1]  ;;  %s83_s1 = smov 120  }
   0x4   :  { %14 = vadd.xlane.f32.xlu0 %v13_v2 }
  0x77   :  { %v15_v4 = vpop.xlane.xlu0 %14 }
  0x78   :  { %v16_v5 = vmul.f32 0.00390625, %v15_v4 }
  0x7a   :  { %v19_v6 = vmul.f32 %v17_v3, %v16_v5 }
  0x7c   :  { %v21_v7 = vsel %vm20_vm0, %v19_v6, 0.0 }
  0x7d   :  { %v22_v8 = vrot.slane %v21_v7, 4 }
  0x7f   :  { %v23_v9 = vadd.f32 %v22_v8, %v21_v7 }
  0x81   :  { %v24_v10 = vrot.slane %v23_v9, 2 }
  0x83   :  { %v25_v11 = vadd.f32 %v24_v10, %v23_v9 }
  0x85   :  { %v26_v12 = vrot.slane %v25_v11, 1 }
  0x87   :  { %v27_v14 = vadd.f32 %v26_v12, %v25_v11 }
  0x89   :  { %v28_v15 = vadd.f32 %v27_v14, %v18_v13 }
  0x8b   :  { %v29_v16 = vmax.f32 %v28_v15, 0.0 }
  0x8d   :  { %v30_v17 = vperm.slane %v29_v16, 0 }
  0x8f   :  { %32 = vrot.lane.b32.xlu0 %v30_v17, %s81_s0 }
 0x101   :  { %v33_v18 = vpop.permute.xlu0 %32 }
 0x102   :  { %v35_v19 = vmul.f32 %v33_v18, %v17_v3 }
 0x104   :  { %37 = vrot.lane.b32.xlu1 %v35_v19, %s82_s17 }
 0x176   :  { %v38_v20 = vpop.permute.xlu1 %37 }
 0x177   :  { %v40_v21 = vsel %vm20_vm0, %v38_v20, 0.0 }
 0x178   :  { %41 = vadd.xlane.f32.xlu1 %v40_v21 }
 0x1eb   :  { %v42_v22 = vpop.xlane.xlu1 %41 }
 0x1ec   :  { %v43_v23 = vadd.f32 %v42_v22, %v17_v3 }
 0x1ee   :  { %v73_v24 = vmul.f32 -1.442695, %v43_v23 }
 0x1f0   :  { %77 = vpow2.f32 %v73_v24 }
 0x1f6   :  { %v78_v25 = vpop.eup %77 }
 0x1f7   :  { %v47_v26 = vadd.f32 1.0, %v78_v25 }
 0x1f9   :  { %79 = vrcp.f32 %v47_v26  ;;  %v59_v30 = vand.u32 2147483648, %v47_v26  ;;  %v57_v32 = vand.u32 2147483647, %v47_v26  ;;  %vm53_vm2 = vweird.f32 %v47_v26 }
 0x1fb   :  { %v60_v34 = vor.u32 1.1754944e-38, %v59_v30  ;;  %vm58_vm4 = vcmp.eq.f32.partialorder %v57_v32, 8.507059e+37 }
 0x1ff   :  { %v80_v27 = vpop.eup %79 }
 0x200   :  { %v49_v28 = vmul.f32 %v80_v27, %v47_v26  ;;  %vm54_vm1 = vweird.f32 %v80_v27 }
 0x201   :  { %vm55_vm3 = vmor %vm53_vm2, %vm54_vm1 }
 0x202   :  { %v50_v29 = vsub.f32 1.0, %v49_v28 }
 0x204   :  { %v51_v31 = vmul.f32 %v80_v27, %v50_v29 }
 0x206   :  { %v52_v33 = vadd.f32 %v80_v27, %v51_v31 }
 0x208   :  { %v56_v35 = vsel %vm55_vm3, %v80_v27, %v52_v33 }
 0x209   :  { %v61_v36 = vsel %vm58_vm4, %v60_v34, %v56_v35 }
 0x20a   :  { %64 = vrot.lane.b32.xlu2 %v61_v36, %s83_s1 }
 0x264   :  { %v65_v37 = vpop.permute.xlu2 %64 }
 0x265   :  { %68 = vst.msk [vmem:[%s118_s2] sm:$0xff] %vm67_vm5, %v65_v37 }

</bundles_post_ra>
